<compile_context>
chip_gen: v7x
topology: tpu7x:2x2x1
jax: 0.10.0
libtpu: 0.0.40
codegen_flags: <defaults>
</compile_context>

<pallas_src>
import jax
import jax.numpy as jnp
from jax.experimental import pallas as pl
from jax.experimental.pallas import tpu as pltpu

BN_EPS = 1e-5


def _bn_conv_tanh_kernel(w_ref, b_ref, x_ref, o_ref):
    # w_ref: SMEM (Cout*Cin,) f32 -- conv weight with BN gamma folded in (flat 1-D)
    # b_ref: SMEM (Cout,)     f32 -- folded bias (W @ beta)
    # x_ref: VMEM (Cin, M)    f32 -- M = N*H*W, channels on sublanes, space on lanes
    # o_ref: VMEM (Cout, M)   f32
    x = x_ref[...]                                   # (Cin, M)
    cin, m = x.shape
    cout = o_ref.shape[0]

    # BatchNorm (training mode), one-pass stats: both lane reductions issue
    # back-to-back on the XLU; var = E[x^2] - mean^2 (biased).
    inv_m = jnp.float32(1.0 / m)
    mean = jnp.sum(x, axis=1, keepdims=True) * inv_m            # (Cin, 1)
    ex2 = jnp.sum(x * x, axis=1, keepdims=True) * inv_m         # (Cin, 1)
    var = ex2 - mean * mean
    x_hat = (x - mean) * jax.lax.rsqrt(var + BN_EPS)            # (Cin, M)

    # 1x1 conv with folded affine: 12 scalar-broadcast FMAs on the VPU
    # (K=3, N=4 is far too small for the MXU), then tanh on the EUP.
    for co in range(cout):
        acc = w_ref[co * cin] * x_hat[0:1, :]
        for ci in range(1, cin):
            acc = acc + w_ref[co * cin + ci] * x_hat[ci:ci + 1, :]
        o_ref[co:co + 1, :] = jnp.tanh(acc + b_ref[co])


def model_tanh_forward(x_nchw, gamma, beta, conv_weight):
    """x_nchw: (N, Cin, H, W) f32; conv_weight: (Cout, Cin, 1, 1) f32."""
    n, cin, h, w = x_nchw.shape
    cout = conv_weight.shape[0]
    assert n == 1, "TODO(synk): fold N into M (with batch-wide BN stats) for N > 1"
    m = h * w

    # NCHW with N=1 is already channels-major: (Cin, M) slab, zero data movement.
    x2d = x_nchw.reshape(cin, m)

    # Fold the static BN affine into the conv (tiny, pure-JAX, done once).
    w2d = conv_weight.reshape(cout, cin)
    w_folded = (w2d * gamma[None, :]).reshape(-1).astype(jnp.float32)  # (Cout*Cin,)
    b_folded = (w2d @ beta).astype(jnp.float32)                        # (Cout,)

    out2d = pl.pallas_call(
        _bn_conv_tanh_kernel,
        out_shape=jax.ShapeDtypeStruct((cout, m), jnp.float32),
        in_specs=[
            pl.BlockSpec(memory_space=pltpu.MemorySpace.SMEM),  # flat folded weight
            pl.BlockSpec(memory_space=pltpu.MemorySpace.SMEM),  # folded bias
            pl.BlockSpec((cin, m), lambda: (0, 0)),             # (Cin, M) slab
        ],
        out_specs=pl.BlockSpec((cout, m), lambda: (0, 0)),       # (Cout, M) slab
    )(w_folded, b_folded, x2d)

    # (Cout, M) -> (1, Cout, H, W): free reshape, no transpose.
    return out2d.reshape(n, cout, h, w)


if __name__ == "__main__":
    key = jax.random.PRNGKey(0)
    k_x, k_w = jax.random.split(key)

    # Input matching the reference script: torch.randn(1, 3, 8, 24)
    x = jax.random.normal(k_x, (1, 3, 8, 24), dtype=jnp.float32)

    cin, cout = 3, 4
    gamma = jnp.ones((cin,), dtype=jnp.float32)   # BatchNorm weight init
    beta = jnp.zeros((cin,), dtype=jnp.float32)   # BatchNorm bias init
    # Conv2d default init: uniform(-1/sqrt(fan_in), 1/sqrt(fan_in)), fan_in = cin
    bound = 1.0 / jnp.sqrt(jnp.float32(cin))
    conv_w = jax.random.uniform(
        k_w, (cout, cin, 1, 1), dtype=jnp.float32, minval=-bound, maxval=bound
    )

    out = model_tanh_forward(x, gamma, beta, conv_w)
    jax.block_until_ready(out)
    assert out.shape == (1, 4, 8, 24), out.shape
    assert bool(jnp.all(jnp.isfinite(out)))
    print("KERNEL_OK")
</pallas_src>

<mosaic_0001>
module attributes {stable_mosaic.version = 11 : i64} {
  func.func @_bn_conv_tanh_kernel(%arg0: memref<12xf32, #tpu.memory_space<smem>>, %arg1: memref<4xf32, #tpu.memory_space<smem>>, %arg2: memref<3x192xf32, #tpu.memory_space<vmem>>, %arg3: memref<4x192xf32, #tpu.memory_space<vmem>>) attributes {dimension_semantics = [], scalar_prefetch = 0 : i64, scratch_operands = 0 : i64, tpu.core_type = #tpu.core_type<tc>} {
    %c0 = arith.constant 0 : index
    %c0_0 = arith.constant 0 : index
    %0 = vector.load %arg2[%c0, %c0_0] : memref<3x192xf32, #tpu.memory_space<vmem>>, vector<3x192xf32>
    %cst = arith.constant dense<0.000000e+00> : vector<3xf32>
    %1 = vector.multi_reduction <add>, %0, %cst [1] : vector<3x192xf32> to vector<3xf32>
    %2 = vector.shape_cast %1 : vector<3xf32> to vector<3x1xf32>
    %cst_1 = arith.constant 0.00520833349 : f32
    %3 = vector.broadcast %cst_1 : f32 to vector<3x1xf32>
    %4 = arith.mulf %2, %3 : vector<3x1xf32>
    %5 = arith.mulf %0, %0 : vector<3x192xf32>
    %cst_2 = arith.constant dense<0.000000e+00> : vector<3xf32>
    %6 = vector.multi_reduction <add>, %5, %cst_2 [1] : vector<3x192xf32> to vector<3xf32>
    %7 = vector.shape_cast %6 : vector<3xf32> to vector<3x1xf32>
    %cst_3 = arith.constant 0.00520833349 : f32
    %8 = vector.broadcast %cst_3 : f32 to vector<3x1xf32>
    %9 = arith.mulf %7, %8 : vector<3x1xf32>
    %10 = arith.mulf %4, %4 : vector<3x1xf32>
    %11 = arith.subf %9, %10 : vector<3x1xf32>
    %12 = vector.broadcast %4 : vector<3x1xf32> to vector<3x192xf32>
    %13 = arith.subf %0, %12 : vector<3x192xf32>
    %cst_4 = arith.constant 9.99999974E-6 : f32
    %14 = vector.broadcast %cst_4 : f32 to vector<3x1xf32>
    %15 = arith.addf %11, %14 : vector<3x1xf32>
    %16 = math.rsqrt %15 : vector<3x1xf32>
    %17 = vector.broadcast %16 : vector<3x1xf32> to vector<3x192xf32>
    %18 = arith.mulf %13, %17 : vector<3x192xf32>
    %c0_5 = arith.constant 0 : index
    %19 = memref.load %arg0[%c0_5] : memref<12xf32, #tpu.memory_space<smem>>
    %20 = vector.extract_strided_slice %18 {offsets = [0, 0], sizes = [1, 192], strides = [1, 1]} : vector<3x192xf32> to vector<1x192xf32>
    %21 = vector.broadcast %19 : f32 to vector<1x192xf32>
    %22 = arith.mulf %21, %20 : vector<1x192xf32>
    %c1 = arith.constant 1 : index
    %23 = memref.load %arg0[%c1] : memref<12xf32, #tpu.memory_space<smem>>
    %24 = vector.extract_strided_slice %18 {offsets = [1, 0], sizes = [1, 192], strides = [1, 1]} : vector<3x192xf32> to vector<1x192xf32>
    %25 = vector.broadcast %23 : f32 to vector<1x192xf32>
    %26 = arith.mulf %25, %24 : vector<1x192xf32>
    %27 = arith.addf %22, %26 : vector<1x192xf32>
    %c2 = arith.constant 2 : index
    %28 = memref.load %arg0[%c2] : memref<12xf32, #tpu.memory_space<smem>>
    %29 = vector.extract_strided_slice %18 {offsets = [2, 0], sizes = [1, 192], strides = [1, 1]} : vector<3x192xf32> to vector<1x192xf32>
    %30 = vector.broadcast %28 : f32 to vector<1x192xf32>
    %31 = arith.mulf %30, %29 : vector<1x192xf32>
    %32 = arith.addf %27, %31 : vector<1x192xf32>
    %c0_6 = arith.constant 0 : index
    %33 = memref.load %arg1[%c0_6] : memref<4xf32, #tpu.memory_space<smem>>
    %34 = vector.broadcast %33 : f32 to vector<1x192xf32>
    %35 = arith.addf %32, %34 : vector<1x192xf32>
    %36 = math.tanh %35 : vector<1x192xf32>
    %c0_7 = arith.constant 0 : index
    %c0_8 = arith.constant 0 : index
    %37 = vector.load %arg3[%c0_7, %c0_8] : memref<4x192xf32, #tpu.memory_space<vmem>>, vector<1x192xf32>
    tpu.vector_store %arg3[%c0_7, %c0_8], %36 {strides = array<i32>} : memref<4x192xf32, #tpu.memory_space<vmem>>, vector<1x192xf32>,
    %c3 = arith.constant 3 : index
    %38 = memref.load %arg0[%c3] : memref<12xf32, #tpu.memory_space<smem>>
    %39 = vector.extract_strided_slice %18 {offsets = [0, 0], sizes = [1, 192], strides = [1, 1]} : vector<3x192xf32> to vector<1x192xf32>
    %40 = vector.broadcast %38 : f32 to vector<1x192xf32>
    %41 = arith.mulf %40, %39 : vector<1x192xf32>
    %c4 = arith.constant 4 : index
    %42 = memref.load %arg0[%c4] : memref<12xf32, #tpu.memory_space<smem>>
    %43 = vector.extract_strided_slice %18 {offsets = [1, 0], sizes = [1, 192], strides = [1, 1]} : vector<3x192xf32> to vector<1x192xf32>
    %44 = vector.broadcast %42 : f32 to vector<1x192xf32>
    %45 = arith.mulf %44, %43 : vector<1x192xf32>
    %46 = arith.addf %41, %45 : vector<1x192xf32>
    %c5 = arith.constant 5 : index
    %47 = memref.load %arg0[%c5] : memref<12xf32, #tpu.memory_space<smem>>
    %48 = vector.extract_strided_slice %18 {offsets = [2, 0], sizes = [1, 192], strides = [1, 1]} : vector<3x192xf32> to vector<1x192xf32>
    %49 = vector.broadcast %47 : f32 to vector<1x192xf32>
    %50 = arith.mulf %49, %48 : vector<1x192xf32>
    %51 = arith.addf %46, %50 : vector<1x192xf32>
    %c1_9 = arith.constant 1 : index
    %52 = memref.load %arg1[%c1_9] : memref<4xf32, #tpu.memory_space<smem>>
    %53 = vector.broadcast %52 : f32 to vector<1x192xf32>
    %54 = arith.addf %51, %53 : vector<1x192xf32>
    %55 = math.tanh %54 : vector<1x192xf32>
    %c1_10 = arith.constant 1 : index
    %c0_11 = arith.constant 0 : index
    %56 = vector.load %arg3[%c1_10, %c0_11] : memref<4x192xf32, #tpu.memory_space<vmem>>, vector<1x192xf32>
    tpu.vector_store %arg3[%c1_10, %c0_11], %55 {strides = array<i32>} : memref<4x192xf32, #tpu.memory_space<vmem>>, vector<1x192xf32>,
    %c6 = arith.constant 6 : index
    %57 = memref.load %arg0[%c6] : memref<12xf32, #tpu.memory_space<smem>>
    %58 = vector.extract_strided_slice %18 {offsets = [0, 0], sizes = [1, 192], strides = [1, 1]} : vector<3x192xf32> to vector<1x192xf32>
    %59 = vector.broadcast %57 : f32 to vector<1x192xf32>
    %60 = arith.mulf %59, %58 : vector<1x192xf32>
    %c7 = arith.constant 7 : index
    %61 = memref.load %arg0[%c7] : memref<12xf32, #tpu.memory_space<smem>>
    %62 = vector.extract_strided_slice %18 {offsets = [1, 0], sizes = [1, 192], strides = [1, 1]} : vector<3x192xf32> to vector<1x192xf32>
    %63 = vector.broadcast %61 : f32 to vector<1x192xf32>
    %64 = arith.mulf %63, %62 : vector<1x192xf32>
    %65 = arith.addf %60, %64 : vector<1x192xf32>
    %c8 = arith.constant 8 : index
    %66 = memref.load %arg0[%c8] : memref<12xf32, #tpu.memory_space<smem>>
    %67 = vector.extract_strided_slice %18 {offsets = [2, 0], sizes = [1, 192], strides = [1, 1]} : vector<3x192xf32> to vector<1x192xf32>
    %68 = vector.broadcast %66 : f32 to vector<1x192xf32>
    %69 = arith.mulf %68, %67 : vector<1x192xf32>
    %70 = arith.addf %65, %69 : vector<1x192xf32>
    %c2_12 = arith.constant 2 : index
    %71 = memref.load %arg1[%c2_12] : memref<4xf32, #tpu.memory_space<smem>>
    %72 = vector.broadcast %71 : f32 to vector<1x192xf32>
    %73 = arith.addf %70, %72 : vector<1x192xf32>
    %74 = math.tanh %73 : vector<1x192xf32>
    %c2_13 = arith.constant 2 : index
    %c0_14 = arith.constant 0 : index
    %75 = vector.load %arg3[%c2_13, %c0_14] : memref<4x192xf32, #tpu.memory_space<vmem>>, vector<1x192xf32>
    tpu.vector_store %arg3[%c2_13, %c0_14], %74 {strides = array<i32>} : memref<4x192xf32, #tpu.memory_space<vmem>>, vector<1x192xf32>,
    %c9 = arith.constant 9 : index
    %76 = memref.load %arg0[%c9] : memref<12xf32, #tpu.memory_space<smem>>
    %77 = vector.extract_strided_slice %18 {offsets = [0, 0], sizes = [1, 192], strides = [1, 1]} : vector<3x192xf32> to vector<1x192xf32>
    %78 = vector.broadcast %76 : f32 to vector<1x192xf32>
    %79 = arith.mulf %78, %77 : vector<1x192xf32>
    %c10 = arith.constant 10 : index
    %80 = memref.load %arg0[%c10] : memref<12xf32, #tpu.memory_space<smem>>
    %81 = vector.extract_strided_slice %18 {offsets = [1, 0], sizes = [1, 192], strides = [1, 1]} : vector<3x192xf32> to vector<1x192xf32>
    %82 = vector.broadcast %80 : f32 to vector<1x192xf32>
    %83 = arith.mulf %82, %81 : vector<1x192xf32>
    %84 = arith.addf %79, %83 : vector<1x192xf32>
    %c11 = arith.constant 11 : index
    %85 = memref.load %arg0[%c11] : memref<12xf32, #tpu.memory_space<smem>>
    %86 = vector.extract_strided_slice %18 {offsets = [2, 0], sizes = [1, 192], strides = [1, 1]} : vector<3x192xf32> to vector<1x192xf32>
    %87 = vector.broadcast %85 : f32 to vector<1x192xf32>
    %88 = arith.mulf %87, %86 : vector<1x192xf32>
    %89 = arith.addf %84, %88 : vector<1x192xf32>
    %c3_15 = arith.constant 3 : index
    %90 = memref.load %arg1[%c3_15] : memref<4xf32, #tpu.memory_space<smem>>
    %91 = vector.broadcast %90 : f32 to vector<1x192xf32>
    %92 = arith.addf %89, %91 : vector<1x192xf32>
    %93 = math.tanh %92 : vector<1x192xf32>
    %c3_16 = arith.constant 3 : index
    %c0_17 = arith.constant 0 : index
    %94 = vector.load %arg3[%c3_16, %c0_17] : memref<4x192xf32, #tpu.memory_space<vmem>>, vector<1x192xf32>
    tpu.vector_store %arg3[%c3_16, %c0_17], %93 {strides = array<i32>} : memref<4x192xf32, #tpu.memory_space<vmem>>, vector<1x192xf32>,
    return
  }
}

</mosaic_0001>

<bundles_post_ra>
// kernel: tpu_custom_call.1
= control target key start
LH: loop header
LB: loop body
LE: loop exit
PB: predicated region body
PF: predicated region fallthrough
CT: control target
= control target key end

     0   :  { %8 = vsyncpa [#allocation5], 0  ;;  %s512_s0 = inlined_call_operand.hbm [shape: f32[12], index: 0, kind: input, shape index: {}]   ;;  %s513_s1 = inlined_call_operand.vmem [shape: f32[4], index: 1, kind: input, shape index: {}]   ;;  %s514_s2 = inlined_call_operand.hbm [shape: f32[3,192], index: 2, kind: input, shape index: {}]   ;;  %s515_s3 = inlined_call_operand.hbm [shape: f32[4,192], index: 3, kind: output, shape index: {}]  }
   0x1   :  { %9 = vsyncpa [#allocation6], 0 }
   0x2   :  { %10 = vsyncpa [#allocation3], 0 }
   0x3   :  { %11 = vsyncpa [#allocation4], 0  ;;  %s26_s14 = sshll.u32 %s513_s1, 4  ;;  %s319_s17 = scalar_lea.hbm %s512_s0, 16  ;;  %s27_s14 = int_to_ptr.vmem [resolvable:$true] %s26_s14 }
   0x4   :  { %p320_p0 = scmp.ne.s32.totalorder %s512_s0, %s319_s17  ;;  %p323_p1 = scmp.lt.u32.totalorder %s319_s17, %s512_s0 }
   0x6   :  { %p325_p2 = pnand %p323_p1, %p320_p0 }
   0x8   :  { %328 = shalt.err (!%p325_p2)
}
   0x9   :  { %s393_s22 = smov [#allocation2]   ;;  %s329_s1 = scalar_lea.vmem %s27_s14, 16 }
   0xa   :  { %19 = dma.hbm_to_smem %s512_s0, 16, %s393_s22, [#allocation5]  }
   0xb   :  { %p330_p3 = scmp.ne.s32.totalorder %s27_s14, %s329_s1  ;;  %p334_p4 = scmp.lt.s32.totalorder %s27_s14, %s27_s14 }
   0xc   :  { %p335_p5 = scmp.lt.s32.totalorder %s329_s1, %s329_s1 }
   0xe   :  { %p336_p6 = por %p335_p5, %p334_p4 }
  0x10   :  { %p337_p7 = pnand %p336_p6, %p330_p3 }
  0x12   :  { %340 = shalt.err (!%p337_p7)
}
  0x13   :  { %s394_s25 = smov [#allocation7]   ;;  %s395_s26 = smov [#allocation8]  }
  0x14   :  { %29 = dma.vmem_to_smem %s27_s14, 16, %s394_s25, [#allocation6]  }
  0x15   :  { %s36_s27 = sshll.u32 %s395_s26, 4  ;;  %s341_s30 = scalar_lea.hbm %s514_s2, 128  ;;  %s37_s27 = int_to_ptr.vmem [resolvable:$true] %s36_s27 }
  0x16   :  { %p342_p8 = scmp.ne.s32.totalorder %s514_s2, %s341_s30  ;;  %p345_p9 = scmp.lt.u32.totalorder %s341_s30, %s514_s2 }
  0x18   :  { %p347_p10 = pnand %p345_p9, %p342_p8 }
  0x1a   :  { %350 = shalt.err (!%p347_p10)
}
  0x1b   :  { %s351_s7 = scalar_lea.vmem %s37_s27, 128  ;;  %p356_p12 = scmp.lt.s32.totalorder %s37_s27, %s37_s27 }
  0x1c   :  { %p352_p11 = scmp.ne.s32.totalorder %s37_s27, %s351_s7  ;;  %p357_p13 = scmp.lt.s32.totalorder %s351_s7, %s351_s7 }
  0x1e   :  { %p358_p0 = por %p357_p13, %p356_p12 }
  0x20   :  { %p359_p1 = pnand %p358_p0, %p352_p11 }
  0x22   :  { %362 = shalt.err (!%p359_p1)
}
  0x23   :  { %39 = dma.hbm_to_vmem [thread:$0]  %s514_s2, 128, %s37_s27, [#allocation3]  }
  0x24   :  { %385 = dma.done.wait [#allocation5], 16  }
  0x25   :  { %386 = vsyncadd [#allocation5], 4294967280 }
  0x26   :  { %387 = dma.done.wait [#allocation6], 16  }
  0x27   :  { %388 = vsyncadd [#allocation6], 4294967280 }
  0x28   :  { %389 = dma.done.wait [#allocation3], 128  }
  0x29   :  { %390 = vsyncadd [#allocation3], 4294967168 }
  0x2a   :  { %49 = sfence }
  0x2b   :  { %v50_v0 = vld [vmem:[#allocation8] sm:$0x77]  ;;  %vm54_vm0 = vcmask 1042432   ;;  %vm56_vm1 = vcmask 518144   ;;  %v396_v15 = vmov 839922192   ;;  %v78_v17 = vlaneseq }
  0x2c   :  { %v52_v1 = vcombine.high %v50_v0, %v50_v0  ;;  %v55_v2 = vsel %vm54_vm0, %v50_v0, 0.0  ;;  %v62_v3 = vmul.f32 %v50_v0, %v50_v0  ;;  %v76_v16 = vunpack.c.l.s4 %v396_v15  ;;  %s449_s2 = sld [smem:[#allocation2]]  ;;  %s451_s10 = sld [smem:[#allocation2 + $0x1]] }
  0x2d   :  { %v447_v21 = vshrl.u32 %v78_v17, 7  ;;  %s453_s11 = sld [smem:[#allocation2 + $0x2]]  ;;  %s456_s12 = sld [smem:[#allocation2 + $0x3]]  ;;  %vm137_vm2 = vcmp.lt.s32.totalorder %v78_v17, 192 }
  0x2e   :  { %v57_v4 = vsel %vm56_vm1, %v52_v1, 0.0  ;;  %v64_v5 = vcombine.high %v62_v3, %v62_v3  ;;  %v66_v6 = vsel %vm54_vm0, %v62_v3, 0.0  ;;  %v77_v20 = vunpack.c.0.s8 %v76_v16  ;;  %s458_s13 = sld [smem:[#allocation2 + $0x4]]  ;;  %s460_s14 = sld [smem:[#allocation2 + $0x5]] }
  0x2f   :  { %v58_v7 = vadd.f32 %v57_v4, %v55_v2  ;;  %s462_s15 = sld [smem:[#allocation2 + $0x6]]  ;;  %s464_s16 = sld [smem:[#allocation2 + $0x7]] }
  0x30   :  { %v67_v8 = vsel %vm56_vm1, %v64_v5, 0.0  ;;  %v80_v22 = vsub.s32 %v77_v20, %v447_v21  ;;  %s466_s17 = sld [smem:[#allocation2 + $0x8]]  ;;  %s468_s18 = sld [smem:[#allocation2 + $0x9]] }
  0x31   :  { %59 = vadd.xlane.f32.xlu0 %v58_v7  ;;  %v68_v9 = vadd.f32 %v67_v8, %v66_v6  ;;  %s470_s19 = sld [smem:[#allocation2 + $0xa]]  ;;  %s472_s20 = sld [smem:[#allocation7]]  ;;  %v397_v8 = vmov 1966171168  }
  0x32   :  { %s474_s21 = sld [smem:[#allocation2 + $0xb]]  ;;  %v97_v27 = vstv %s449_s2  ;;  %v100_v28 = vstv %s451_s10  ;;  %s482_s22 = sld [smem:[#allocation7 + $0x1]] }
  0x33   :  { %v108_v29 = vstv %s453_s11  ;;  %v141_v30 = vstv %s456_s12  ;;  %s485_s23 = sld [smem:[#allocation7 + $0x2]]  ;;  %s493_s24 = sld [smem:[#allocation7 + $0x3]] }
  0x34   :  { %v144_v32 = vstv %s458_s13  ;;  %v152_v33 = vstv %s460_s14  ;;  %s398_s1 = smov [#allocation9]  }
  0x35   :  { %69 = vadd.xlane.f32.xlu0 %v68_v9  ;;  %v185_v34 = vstv %s464_s16  ;;  %v182_v35 = vstv %s462_s15  ;;  %v121_v9 = vunpack.c.l.s4 %v397_v8  ;;  %s269_s25 = sshll.u32 %s398_s1, 4  ;;  %s270_s25 = int_to_ptr.vmem [resolvable:$true] %s269_s25 }
  0x36   :  { %v193_v36 = vstv %s466_s17  ;;  %v223_v37 = vstv %s468_s18  ;;  %s363_s26 = scalar_lea.vmem %s270_s25, 128  ;;  %p368_p3 = scmp.lt.s32.totalorder %s270_s25, %s270_s25 }
  0x37   :  { %v226_v38 = vstv %s470_s19  ;;  %v116_v41 = vstv %s472_s20  ;;  %p364_p2 = scmp.ne.s32.totalorder %s270_s25, %s363_s26  ;;  %p369_p4 = scmp.lt.s32.totalorder %s363_s26, %s363_s26 }
  0x38   :  { %v234_v42 = vstv %s474_s21 }
  0x39   :  { %v201_v1 = vstv %s485_s23  ;;  %v242_v7 = vstv %s493_s24  ;;  %p370_p5 = por %p369_p4, %p368_p3 }
  0x3b   :  { %p371_p6 = pnand %p370_p5, %p364_p2 }
  0xbe   :  { %v60_v10 = vpop.xlane.xlu0 %59 }
  0xbf   :  { %v61_v11 = vmul.f32 0.0052083335, %v60_v10 }
  0xc1   :  { %v72_v13 = vmul.f32 %v61_v11, %v61_v11  ;;  %v81_v23 = vrot.slane %v61_v11, %v80_v22 }
  0xc2   :  { %v70_v12 = vpop.xlane.xlu0 %69 }
  0xc3   :  { %v71_v14 = vmul.f32 0.0052083335, %v70_v12  ;;  %v83_v25 = vsub.f32 %v50_v0, %v81_v23  ;;  %v160_v0 = vstv %s482_s22 }
  0xc5   :  { %v73_v18 = vsub.f32 %v71_v14, %v72_v13  ;;  %v122_v14 = vunpack.c.0.s8 %v121_v9 }
  0xc7   :  { %v84_v19 = vadd.f32 1e-05, %v73_v18  ;;  %v125_v15 = vsub.s32 %v122_v14, %v447_v21 }
  0xc9   :  { %309 = vrsqrt.f32 %v84_v19 }
  0xd3   :  { %v310_v24 = vpop.eup %309 }
  0xd4   :  { %v93_v26 = vrot.slane %v310_v24, %v80_v22 }
  0xd6   :  { %v95_v31 = vmul.f32 %v93_v26, %v83_v25 }
  0xd8   :  { %v101_v39 = vmul.f32 %v100_v28, %v95_v31  ;;  %v109_v40 = vmul.f32 %v108_v29, %v95_v31  ;;  %v98_v43 = vmul.f32 %v97_v27, %v95_v31  ;;  %v145_v44 = vmul.f32 %v144_v32, %v95_v31 }
  0xd9   :  { %v153_v45 = vmul.f32 %v152_v33, %v95_v31  ;;  %v186_v46 = vmul.f32 %v185_v34, %v95_v31  ;;  %v142_v48 = vmul.f32 %v141_v30, %v95_v31  ;;  %v183_v49 = vmul.f32 %v182_v35, %v95_v31 }
  0xda   :  { %v281_v47 = vrot.slane %v101_v39, 9  ;;  %v194_v50 = vmul.f32 %v193_v36, %v95_v31  ;;  %v283_v51 = vrot.slane %v109_v40, 10  ;;  %v286_v52 = vrot.slane %v145_v44, 9 }
  0xdb   :  { %v292_v53 = vrot.slane %v186_v46, 9  ;;  %v227_v54 = vmul.f32 %v226_v38, %v95_v31  ;;  %v288_v56 = vrot.slane %v153_v45, 10  ;;  %v224_v57 = vmul.f32 %v223_v37, %v95_v31 }
  0xdc   :  { %v106_v55 = vadd.f32 %v281_v47, %v98_v43  ;;  %v235_v58 = vmul.f32 %v234_v42, %v95_v31  ;;  %v150_v59 = vadd.f32 %v286_v52, %v142_v48  ;;  %v294_v61 = vrot.slane %v194_v50, 10 }
  0xdd   :  { %v191_v60 = vadd.f32 %v292_v53, %v183_v49  ;;  %v298_v62 = vrot.slane %v227_v54, 9 }
  0xde   :  { %v114_v63 = vadd.f32 %v283_v51, %v106_v55  ;;  %v158_v2 = vadd.f32 %v288_v56, %v150_v59  ;;  %v300_v5 = vrot.slane %v235_v58, 10 }
  0xdf   :  { %v199_v3 = vadd.f32 %v294_v61, %v191_v60  ;;  %v232_v4 = vadd.f32 %v298_v62, %v224_v57 }
  0xe0   :  { %v117_v6 = vadd.f32 %v116_v41, %v114_v63  ;;  %v161_v10 = vadd.f32 %v160_v0, %v158_v2 }
  0xe1   :  { %v202_v11 = vadd.f32 %v201_v1, %v199_v3  ;;  %v240_v12 = vadd.f32 %v300_v5, %v232_v4 }
  0xe2   :  { %311 = vtanh.f32 %v117_v6 }
  0xe3   :  { %313 = vtanh.f32 %v161_v10  ;;  %v243_v13 = vadd.f32 %v242_v7, %v240_v12 }
  0xe4   :  { %315 = vtanh.f32 %v202_v11 }
  0xe5   :  { %317 = vtanh.f32 %v243_v13 }
  0xec   :  { %v312_v16 = vpop.eup %311 }
  0xed   :  { %v314_v18 = vpop.eup %313  ;;  %v126_v19 = vrot.slane %v312_v16, %v125_v15 }
  0xee   :  { %v316_v20 = vpop.eup %315  ;;  %v170_v22 = vrot.slane %v314_v18, %v125_v15 }
  0xef   :  { %v318_v23 = vpop.eup %317  ;;  %v133_v24 = vrot.slane %v126_v19, %v125_v15  ;;  %v211_v25 = vrot.slane %v316_v20, %v125_v15 }
  0xf0   :  { %v177_v26 = vrot.slane %v170_v22, %v125_v15  ;;  %v252_v27 = vrot.slane %v318_v23, %v125_v15 }
  0xf1   :  { %139 = vst.msk [vmem:[#allocation9] ss:$4 sm:$0x3] %vm137_vm2, %v133_v24  ;;  %v218_v28 = vrot.slane %v211_v25, %v125_v15 }
  0xf2   :  { %180 = vst.msk [vmem:[#allocation9 + $0x1] ss:$4 sm:$0x3] %vm137_vm2, %v177_v26  ;;  %v259_v29 = vrot.slane %v252_v27, %v125_v15 }
  0xf3   :  { %221 = vst.msk [vmem:[#allocation9 + $0x2] ss:$4 sm:$0x3] %vm137_vm2, %v218_v28 }
  0xf4   :  { %262 = vst.msk [vmem:[#allocation9 + $0x3] ss:$4 sm:$0x3] %vm137_vm2, %v259_v29 }
  0xf5   :  { %374 = shalt.err (!%p371_p6)
}
  0xf6   :  { %s375_s29 = scalar_lea.hbm %s515_s3, 128 }
  0xf7   :  { %p376_p7 = scmp.ne.s32.totalorder %s515_s3, %s375_s29  ;;  %p379_p8 = scmp.lt.u32.totalorder %s375_s29, %s515_s3 }
  0xf9   :  { %p381_p9 = pnand %p379_p8, %p376_p7 }
  0xfb   :  { %384 = shalt.err (!%p381_p9)
}
  0xfc   :  { %272 = dma.vmem_to_hbm [thread:$0]  %s270_s25, 128, %s515_s3, [#allocation4]  }
  0xfd   :  { %391 = dma.done.wait [#allocation4], 128  }
  0xfe   :  { %392 = vsyncadd [#allocation4], 4294967168 }
  0xff   :  { %276 = vsyncpa [#allocation3], 1 }
 0x100   :  { %277 = vsyncpa [#allocation4], 1 }
 0x101   :  { %278 = vsyncpa [#allocation5], 1 }
 0x102   :  { %279 = vsyncpa [#allocation6], 1 }

</bundles_post_ra>
